<compile_context>
chip_gen: v5e
topology: v5e:2x2
jax: 0.10.0
libtpu: 0.0.40
codegen_flags: <defaults>
</compile_context>

<pallas_src>
import jax
import jax.numpy as jnp
from jax.experimental import pallas as pl
from jax.experimental.pallas import tpu as pltpu


def _cdiv(a, b):
    return (a + b - 1) // b


def _round_up(x, m):
    return ((x + m - 1) // m) * m


def churn_kernel(x_ref, w1t_ref, wpk_ref, b_ref, o_ref):
    # x tile arrives already transposed (feature-major): (input_dim, TB) f32.
    xt = x_ref[...].astype(jnp.bfloat16)

    # fc1 + relu (dropout1 = identity at inference): (128, in) @ (in, TB)
    h = jnp.dot(w1t_ref[...], xt, preferred_element_type=jnp.float32)
    h = jnp.maximum(h + b_ref[0:128, :], 0.0)                      # (128, TB)

    # fc2 + relu (dropout2 = identity at inference): (64, 128) @ (128, TB)
    h = jnp.dot(wpk_ref[0:64, :], h.astype(jnp.bfloat16),
                preferred_element_type=jnp.float32)
    h = jnp.maximum(h + b_ref[128:192, :], 0.0)                    # (64, TB)

    # fc3 + relu: (32, 64) @ (64, TB)
    h = jnp.dot(wpk_ref[64:96, 0:64], h.astype(jnp.bfloat16),
                preferred_element_type=jnp.float32)
    h = jnp.maximum(h + b_ref[192:224, :], 0.0)                    # (32, TB)

    # fc4 + relu: (16, 32) @ (32, TB)
    h = jnp.dot(wpk_ref[96:112, 0:32], h.astype(jnp.bfloat16),
                preferred_element_type=jnp.float32)
    h = jnp.maximum(h + b_ref[224:240, :], 0.0)                    # (16, TB)

    # fc5 (16 -> 1): sublane-scaled reduce on the already feature-major tensor,
    # scalar bias, sigmoid; result is the lane-dense (1, TB) output tile.
    z = jnp.sum(h * b_ref[240:256, :], axis=0, keepdims=True) + b_ref[256:257, :]
    o_ref[...] = jax.nn.sigmoid(z).astype(o_ref.dtype)


def churn_forward(x, params, *, max_batch_tile=4096):
    """x: (B, input_dim) f32; params: list of (W, b) with W:(in,out), b:(1,out)."""
    B, input_dim = x.shape

    # --- batch tiling: minimal padding; >= 2 tiles when possible (v7x megacore)
    B128 = _round_up(B, 128)
    nb = max(_cdiv(B128, max_batch_tile), 2 if B128 >= 256 else 1)
    TB = _round_up(_cdiv(B, nb), 128)
    B_pad = nb * TB

    # Feature-major input: (input_dim, B_pad); batch padded with zeros.
    x_t = jnp.pad(x.T, ((0, 0), (0, B_pad - B)))

    (w1, b1), (w2, b2), (w3, b3), (w4, b4), (w5, b5) = params

    # Packed operands (3 small VMEM-resident arrays instead of 10).
    w1t = w1.T.astype(jnp.bfloat16)                       # (128, input_dim)
    wpk = jnp.concatenate([
        w2.T,                                             # (64, 128)
        jnp.pad(w3.T, ((0, 0), (0, 64))),                 # (32, 128)
        jnp.pad(w4.T, ((0, 0), (0, 96))),                 # (16, 128)
    ], axis=0).astype(jnp.bfloat16)                       # (112, 128) bf16
    bpk = jnp.concatenate([
        b1.reshape(128, 1), b2.reshape(64, 1), b3.reshape(32, 1),
        b4.reshape(16, 1), w5.reshape(16, 1), b5.reshape(1, 1),
        jnp.zeros((7, 1), jnp.float32),
    ], axis=0).astype(jnp.float32)                        # (264, 1) f32

    flops = 2 * B_pad * (input_dim * 128 + 128 * 64 + 64 * 32 + 32 * 16 + 16)
    bytes_accessed = (x_t.size * 4 + B_pad * 4
                      + w1t.size * 2 + wpk.size * 2 + bpk.size * 4)

    out = pl.pallas_call(
        churn_kernel,
        out_shape=jax.ShapeDtypeStruct((1, B_pad), jnp.float32),
        grid=(nb,),
        in_specs=[
            pl.BlockSpec((input_dim, TB), lambda i: (0, i)),   # x^T batch tile
            pl.BlockSpec(w1t.shape, lambda i: (0, 0)),         # VMEM-resident
            pl.BlockSpec(wpk.shape, lambda i: (0, 0)),
            pl.BlockSpec(bpk.shape, lambda i: (0, 0)),
        ],
        out_specs=pl.BlockSpec((1, TB), lambda i: (0, i)),     # lane-dense out
        compiler_params=pltpu.CompilerParams(
            dimension_semantics=("parallel",),
            vmem_limit_bytes=32 * 1024 * 1024),
        cost_estimate=pl.CostEstimate(
            flops=flops, transcendentals=B_pad, bytes_accessed=bytes_accessed),
    )(x_t, w1t, wpk, bpk)

    # (1, B_pad) lane-dense output -> (B, 1)
    return out[0, :B].reshape(B, 1)


def init_params(key, input_dim):
    """Deterministic param init matching ChurnModel layer shapes (nn.Linear init)."""
    dims = [input_dim, 128, 64, 32, 16, 1]
    params = []
    for i in range(len(dims) - 1):
        key, kw, kb = jax.random.split(key, 3)
        fan_in = dims[i]
        bound = 1.0 / jnp.sqrt(fan_in)
        w = jax.random.uniform(kw, (dims[i], dims[i + 1]), jnp.float32, -bound, bound)
        b = jax.random.uniform(kb, (1, dims[i + 1]), jnp.float32, -bound, bound)
        params.append((w, b))
    return params


def reference_forward(x, params):
    h = x
    for i, (w, b) in enumerate(params):
        h = h @ w + b
        if i < len(params) - 1:
            h = jnp.maximum(h, 0.0)
        else:
            h = jax.nn.sigmoid(h)
    return h


if __name__ == "__main__":
    key = jax.random.PRNGKey(0)
    input_dim = 32
    batch = 8

    k_x, k_p = jax.random.split(key)
    x = jax.random.normal(k_x, (batch, input_dim), jnp.float32)
    params = init_params(k_p, input_dim)

    out = churn_forward(x, params)
    out = jax.block_until_ready(out)

    ref = reference_forward(x, params)
    assert out.shape == (batch, 1)
    # bf16 MXU operands vs f32 reference -> loosened tolerance.
    assert jnp.allclose(out, ref, atol=5e-2, rtol=0.0), "mismatch vs reference"

    print("KERNEL_OK")
</pallas_src>

<mosaic_0001>
module attributes {stable_mosaic.version = 11 : i64} {
  func.func @churn_kernel(%arg0: i32, %arg1: memref<32x128xf32, #tpu.memory_space<vmem>>, %arg2: memref<128x32xbf16, #tpu.memory_space<vmem>>, %arg3: memref<112x128xbf16, #tpu.memory_space<vmem>>, %arg4: memref<264x1xf32, #tpu.memory_space<vmem>>, %arg5: memref<1x128xf32, #tpu.memory_space<vmem>>) attributes {dimension_semantics = [#tpu.dimension_semantics<parallel>], iteration_bounds = array<i64: 1>, scalar_prefetch = 0 : i64, scratch_operands = 0 : i64, tpu.core_type = #tpu.core_type<tc>, window_params = [{transform_indices = @transform_0, window_bounds = array<i64: 32, 128>}, {pipeline_mode = #tpu.pipeline_mode<synchronous>, transform_indices = @transform_1, window_bounds = array<i64: 128, 32>}, {pipeline_mode = #tpu.pipeline_mode<synchronous>, transform_indices = @transform_2, window_bounds = array<i64: 112, 128>}, {pipeline_mode = #tpu.pipeline_mode<synchronous>, transform_indices = @transform_3, window_bounds = array<i64: 264, 1>}, {transform_indices = @transform_4, window_bounds = array<i64: 1, 128>}]} {
    %c0 = arith.constant 0 : index
    %c0_0 = arith.constant 0 : index
    %0 = vector.load %arg1[%c0, %c0_0] : memref<32x128xf32, #tpu.memory_space<vmem>>, vector<32x128xf32>
    %1 = arith.truncf %0 : vector<32x128xf32> to vector<32x128xbf16>
    %c0_1 = arith.constant 0 : index
    %c0_2 = arith.constant 0 : index
    %2 = vector.load %arg2[%c0_1, %c0_2] : memref<128x32xbf16, #tpu.memory_space<vmem>>, vector<128x32xbf16>
    %cst = arith.constant dense<0.000000e+00> : vector<128x128xf32>
    %3 = tpu.matmul %2, %1, %cst {dimension_numbers = #tpu.dot_dimension_numbers<[1], [0], [0], [1], [0, 0, 1, 1], [], []>} : vector<128x32xbf16>, vector<32x128xbf16>, vector<128x128xf32> -> vector<128x128xf32>
    %c0_3 = arith.constant 0 : index
    %c0_4 = arith.constant 0 : index
    %4 = vector.load %arg4[%c0_3, %c0_4] : memref<264x1xf32, #tpu.memory_space<vmem>>, vector<128x1xf32>
    %5 = vector.broadcast %4 : vector<128x1xf32> to vector<128x128xf32>
    %6 = arith.addf %3, %5 : vector<128x128xf32>
    %cst_5 = arith.constant 0.000000e+00 : f32
    %7 = vector.broadcast %cst_5 : f32 to vector<128x128xf32>
    %8 = arith.maximumf %6, %7 : vector<128x128xf32>
    %c0_6 = arith.constant 0 : index
    %c0_7 = arith.constant 0 : index
    %9 = vector.load %arg3[%c0_6, %c0_7] : memref<112x128xbf16, #tpu.memory_space<vmem>>, vector<64x128xbf16>
    %10 = arith.truncf %8 : vector<128x128xf32> to vector<128x128xbf16>
    %cst_8 = arith.constant dense<0.000000e+00> : vector<64x128xf32>
    %11 = tpu.matmul %9, %10, %cst_8 {dimension_numbers = #tpu.dot_dimension_numbers<[1], [0], [0], [1], [0, 0, 1, 1], [], []>} : vector<64x128xbf16>, vector<128x128xbf16>, vector<64x128xf32> -> vector<64x128xf32>
    %c128 = arith.constant 128 : index
    %c0_9 = arith.constant 0 : index
    %12 = vector.load %arg4[%c128, %c0_9] : memref<264x1xf32, #tpu.memory_space<vmem>>, vector<64x1xf32>
    %13 = vector.broadcast %12 : vector<64x1xf32> to vector<64x128xf32>
    %14 = arith.addf %11, %13 : vector<64x128xf32>
    %cst_10 = arith.constant 0.000000e+00 : f32
    %15 = vector.broadcast %cst_10 : f32 to vector<64x128xf32>
    %16 = arith.maximumf %14, %15 : vector<64x128xf32>
    %c64 = arith.constant 64 : index
    %c0_11 = arith.constant 0 : index
    %17 = vector.load %arg3[%c64, %c0_11] : memref<112x128xbf16, #tpu.memory_space<vmem>>, vector<32x64xbf16>
    %18 = arith.truncf %16 : vector<64x128xf32> to vector<64x128xbf16>
    %cst_12 = arith.constant dense<0.000000e+00> : vector<32x128xf32>
    %19 = tpu.matmul %17, %18, %cst_12 {dimension_numbers = #tpu.dot_dimension_numbers<[1], [0], [0], [1], [0, 0, 1, 1], [], []>} : vector<32x64xbf16>, vector<64x128xbf16>, vector<32x128xf32> -> vector<32x128xf32>
    %c192 = arith.constant 192 : index
    %c0_13 = arith.constant 0 : index
    %20 = vector.load %arg4[%c192, %c0_13] : memref<264x1xf32, #tpu.memory_space<vmem>>, vector<32x1xf32>
    %21 = vector.broadcast %20 : vector<32x1xf32> to vector<32x128xf32>
    %22 = arith.addf %19, %21 : vector<32x128xf32>
    %cst_14 = arith.constant 0.000000e+00 : f32
    %23 = vector.broadcast %cst_14 : f32 to vector<32x128xf32>
    %24 = arith.maximumf %22, %23 : vector<32x128xf32>
    %c96 = arith.constant 96 : index
    %c0_15 = arith.constant 0 : index
    %25 = vector.load %arg3[%c96, %c0_15] : memref<112x128xbf16, #tpu.memory_space<vmem>>, vector<16x32xbf16>
    %26 = arith.truncf %24 : vector<32x128xf32> to vector<32x128xbf16>
    %cst_16 = arith.constant dense<0.000000e+00> : vector<16x128xf32>
    %27 = tpu.matmul %25, %26, %cst_16 {dimension_numbers = #tpu.dot_dimension_numbers<[1], [0], [0], [1], [0, 0, 1, 1], [], []>} : vector<16x32xbf16>, vector<32x128xbf16>, vector<16x128xf32> -> vector<16x128xf32>
    %c224 = arith.constant 224 : index
    %c0_17 = arith.constant 0 : index
    %28 = vector.load %arg4[%c224, %c0_17] : memref<264x1xf32, #tpu.memory_space<vmem>>, vector<16x1xf32>
    %29 = vector.broadcast %28 : vector<16x1xf32> to vector<16x128xf32>
    %30 = arith.addf %27, %29 : vector<16x128xf32>
    %cst_18 = arith.constant 0.000000e+00 : f32
    %31 = vector.broadcast %cst_18 : f32 to vector<16x128xf32>
    %32 = arith.maximumf %30, %31 : vector<16x128xf32>
    %c240 = arith.constant 240 : index
    %c0_19 = arith.constant 0 : index
    %33 = vector.load %arg4[%c240, %c0_19] : memref<264x1xf32, #tpu.memory_space<vmem>>, vector<16x1xf32>
    %34 = vector.broadcast %33 : vector<16x1xf32> to vector<16x128xf32>
    %35 = arith.mulf %32, %34 : vector<16x128xf32>
    %cst_20 = arith.constant dense<0.000000e+00> : vector<128xf32>
    %36 = vector.multi_reduction <add>, %35, %cst_20 [0] : vector<16x128xf32> to vector<128xf32>
    %37 = vector.shape_cast %36 : vector<128xf32> to vector<1x128xf32>
    %c256 = arith.constant 256 : index
    %c0_21 = arith.constant 0 : index
    %38 = vector.load %arg4[%c256, %c0_21] : memref<264x1xf32, #tpu.memory_space<vmem>>, vector<1x1xf32>
    %39 = vector.broadcast %38 : vector<1x1xf32> to vector<1x128xf32>
    %40 = arith.addf %37, %39 : vector<1x128xf32>
    %41 = arith.negf %40 : vector<1x128xf32>
    %42 = math.exp %41 : vector<1x128xf32>
    %cst_22 = arith.constant 1.000000e+00 : f32
    %43 = vector.broadcast %cst_22 : f32 to vector<1x128xf32>
    %44 = arith.addf %43, %42 : vector<1x128xf32>
    %45 = arith.divf %43, %44 : vector<1x128xf32>
    %c0_23 = arith.constant 0 : index
    %c0_24 = arith.constant 0 : index
    %46 = vector.load %arg5[%c0_23, %c0_24] : memref<1x128xf32, #tpu.memory_space<vmem>>, vector<1x128xf32>
    tpu.vector_store %arg5[%c0_23, %c0_24], %45 {strides = array<i32>} : memref<1x128xf32, #tpu.memory_space<vmem>>, vector<1x128xf32>,
    return
  }
  func.func @transform_0(%arg0: i32) -> (i32, i32) {
    %c0_i32 = arith.constant 0 : i32
    %c0_i32_0 = arith.constant 0 : i32
    return %c0_i32, %arg0 : i32, i32
  }
  func.func @transform_1(%arg0: i32) -> (i32, i32) {
    %c0_i32 = arith.constant 0 : i32
    %c0_i32_0 = arith.constant 0 : i32
    %c0_i32_1 = arith.constant 0 : i32
    return %c0_i32, %c0_i32_0 : i32, i32
  }
  func.func @transform_2(%arg0: i32) -> (i32, i32) {
    %c0_i32 = arith.constant 0 : i32
    %c0_i32_0 = arith.constant 0 : i32
    %c0_i32_1 = arith.constant 0 : i32
    return %c0_i32, %c0_i32_0 : i32, i32
  }
  func.func @transform_3(%arg0: i32) -> (i32, i32) {
    %c0_i32 = arith.constant 0 : i32
    %c0_i32_0 = arith.constant 0 : i32
    %c0_i32_1 = arith.constant 0 : i32
    return %c0_i32, %c0_i32_0 : i32, i32
  }
  func.func @transform_4(%arg0: i32) -> (i32, i32) {
    %c0_i32 = arith.constant 0 : i32
    %c0_i32_0 = arith.constant 0 : i32
    return %c0_i32, %arg0 : i32, i32
  }
}

</mosaic_0001>

<bundles_post_ra>
// kernel: tpu_custom_call.1
= control target key start
LH: loop header
LB: loop body
LE: loop exit
PB: predicated region body
PF: predicated region fallthrough
CT: control target
= control target key end

     0   :  { %v700_v3 = vmov 0   ;;  %s902_s0 = inlined_call_operand.vmem [shape: f32[32,128], index: 0, kind: input, shape index: {}]   ;;  %s903_s1 = inlined_call_operand.vmem [shape: bf16[128,32], index: 1, kind: input, shape index: {}]   ;;  %s904_s2 = inlined_call_operand.vmem [shape: bf16[112,128], index: 2, kind: input, shape index: {}]   ;;  %s905_s3 = inlined_call_operand.vmem [shape: f32[264,1], index: 3, kind: input, shape index: {}]   ;;  %s906_s4 = inlined_call_operand.hbm [shape: f32[1,128], index: 4, kind: output, shape index: {}]  }
   0x1   :  { %v55_v0 = vld [vmem:[%s905_s3 + $0x70] sm:$0xff]  ;;  %v53_v1 = vld [vmem:[%s905_s3 + $0x60] sm:$0xff]  ;;  %668 = vset.pattern.permute.xlu1 %v700_v3  ;;  %667 = vset.pattern.permute.xlu0 %v700_v3  ;;  %v22_v4 = vld [vmem:[%s902_s0 + $0x18] sm:$0xff] }
   0x2   :  { %v21_v2 = vld [vmem:[%s902_s0 + $0x10] sm:$0xff]  ;;  %v19_v5 = vld [vmem:[%s902_s0] sm:$0xff]  ;;  %v20_v6 = vld [vmem:[%s902_s0 + $0x8] sm:$0xff]  ;;  %129 = vperm.xlu0 %667, %v55_v0   ;;  %119 = vperm.xlu1 %668, %v53_v1  }
   0x3   :  { %v24_v7 = vpack.c.bf16 %v22_v4, %v21_v2  ;;  %669 = vset.pattern.permute.xlu2 %v700_v3  ;;  %v51_v8 = vld [vmem:[%s905_s3 + $0x50] sm:$0xff]  ;;  %v23_v9 = vpack.c.bf16 %v20_v6, %v19_v5  ;;  %v56_v10 = vld [vmem:[%s905_s3 + $0x78] sm:$0xff]  ;;  %v54_v11 = vld [vmem:[%s905_s3 + $0x68] sm:$0xff] }
   0x4   :  { %109 = vperm.xlu2 %669, %v51_v8   ;;  %v640_v12 = vld [vmem:[%s903_s1] sm:$0xff]  ;;  %v645_v13 = vld [vmem:[%s903_s1 + $0x28] sm:$0xff] }
   0x5   :  { %208 = vmatpush.bf16.msra.mxu0 %v24_v7  ;;  %655 = vmatpush.bf16.msra.mxu3 %v24_v7 }
   0x6   :  { %9 = vsyncpa [#allocation3], 0  ;;  %vm177_vm0 = vcmask 261120   ;;  %v52_v14 = vld [vmem:[%s905_s3 + $0x58] sm:$0xff]  ;;  %v50_v15 = vld [vmem:[%s905_s3 + $0x48] sm:$0xff]  ;;  %vm434_vm1 = vcmask 523264  }
   0x7   :  { %v49_v16 = vld [vmem:[%s905_s3 + $0x40] sm:$0xff]  ;;  %v47_v17 = vld [vmem:[%s905_s3 + $0x30] sm:$0xff]  ;;  %v48_v18 = vld [vmem:[%s905_s3 + $0x38] sm:$0xff]  ;;  %s559_s12 = sshll.u32 %s906_s4, 4  ;;  %s560_s12 = int_to_ptr.hbm [resolvable:$true] %s559_s12 }
   0x8   :  { %v45_v19 = vld [vmem:[%s905_s3 + $0x20] sm:$0xff]  ;;  %v641_v20 = vld [vmem:[%s903_s1 + $0x8] sm:$0xff]  ;;  %v646_v21 = vld [vmem:[%s903_s1 + $0x30] sm:$0xff] }
   0x9   :  { %209 = vmatpush.bf16.msra.mxu0 %v23_v9  ;;  %656 = vmatpush.bf16.msra.mxu3 %v23_v9  ;;  %v46_v22 = vld [vmem:[%s905_s3 + $0x28] sm:$0xff]  ;;  %v44_v23 = vld [vmem:[%s905_s3 + $0x18] sm:$0xff]  ;;  %v43_v24 = vld [vmem:[%s905_s3 + $0x10] sm:$0xff] }
   0xa   :  { %134 = vperm.xlu0 %667, %v56_v10   ;;  %124 = vperm.xlu1 %668, %v54_v11   ;;  %v41_v25 = vld [vmem:[%s905_s3] sm:$0xff]  ;;  %v289_v26 = vld [vmem:[%s905_s3 + $0xb0] sm:$0xff]  ;;  %v42_v27 = vld [vmem:[%s905_s3 + $0x8] sm:$0xff] }
   0xb   :  { %v642_v28 = vld [vmem:[%s903_s1 + $0x10] sm:$0xff]  ;;  %v647_v29 = vld [vmem:[%s903_s1 + $0x38] sm:$0xff]  ;;  %v288_v31 = vld [vmem:[%s905_s3 + $0xa8] sm:$0xff] }
   0xc   :  { %600 = vmatmul.msk.bf16.vlgmr.msra.gmra.mxu0 %vm177_vm0, %v640_v12  ;;  %605 = vmatmul.msk.bf16.vlgmr.msra.gmra.mxu3 %vm177_vm0, %v645_v13  ;;  %v290_v30 = vld [vmem:[%s905_s3 + $0xb8] sm:$0xff]  ;;  %v287_v32 = vld [vmem:[%s905_s3 + $0xa0] sm:$0xff]  ;;  %v285_v33 = vld [vmem:[%s905_s3 + $0x90] sm:$0xff] }
   0xd   :  { %114 = vperm.xlu2 %669, %v52_v14   ;;  %v283_v34 = vld [vmem:[%s905_s3 + $0x80] sm:$0xff]  ;;  %v286_v35 = vld [vmem:[%s905_s3 + $0x98] sm:$0xff]  ;;  %v284_v37 = vld [vmem:[%s905_s3 + $0x88] sm:$0xff] }
   0xe   :  { %v643_v36 = vld [vmem:[%s903_s1 + $0x18] sm:$0xff]  ;;  %v402_v39 = vld [vmem:[%s905_s3 + $0xd0] sm:$0xff]  ;;  %v400_v40 = vld [vmem:[%s905_s3 + $0xc0] sm:$0xff] }
   0xf   :  { %v403_v38 = vld [vmem:[%s905_s3 + $0xd8] sm:$0xff]  ;;  %v468_v41 = vld [vmem:[%s905_s3 + $0xe0] sm:$0xff]  ;;  %v401_v42 = vld [vmem:[%s905_s3 + $0xc8] sm:$0xff] }
  0x10   :  { %v644_v43 = vld [vmem:[%s903_s1 + $0x20] sm:$0xff]  ;;  %v469_v44 = vld [vmem:[%s905_s3 + $0xe8] sm:$0xff]  ;;  %v505_v45 = vld [vmem:[%s905_s3 + $0xf8] sm:$0xff] }
  0x11   :  { %v504_v46 = vld [vmem:[%s905_s3 + $0xf0] sm:$0xff]  ;;  %v525_v47 = vld [vmem:[%s905_s3 + $0x100] sm:$0x1] }
  0x12   :  { %104 = vperm.xlu1 %668, %v50_v15   ;;  %99 = vperm.xlu0 %667, %v49_v16  }
  0x15   :  { %89 = vperm.xlu2 %669, %v47_v17  }
  0x1a   :  { %94 = vperm.xlu0 %667, %v48_v18   ;;  %79 = vperm.xlu1 %668, %v45_v19  }
  0x1c   :  { %601 = vmatmul.msk.bf16.gmra.mxu0 %vm177_vm0, %v641_v20  ;;  %606 = vmatmul.msk.bf16.gmra.mxu3 %vm177_vm0, %v646_v21 }
  0x1d   :  { %84 = vperm.xlu2 %669, %v46_v22  }
  0x22   :  { %74 = vperm.xlu1 %668, %v44_v23   ;;  %69 = vperm.xlu0 %667, %v43_v24  }
  0x25   :  { %59 = vperm.xlu2 %669, %v41_v25  }
  0x2a   :  { %323 = vperm.xlu1 %668, %v289_v26   ;;  %64 = vperm.xlu0 %667, %v42_v27  }
  0x2c   :  { %602 = vmatmul.msk.bf16.gmra.mxu0 %vm177_vm0, %v642_v28  ;;  %607 = vmatmul.msk.bf16.gmra.mxu3 %vm177_vm0, %v647_v29 }
  0x2d   :  { %328 = vperm.xlu2 %669, %v290_v30  }
  0x32   :  { %318 = vperm.xlu1 %668, %v288_v31   ;;  %313 = vperm.xlu0 %667, %v287_v32  }
  0x35   :  { %303 = vperm.xlu2 %669, %v285_v33  }
  0x3a   :  { %293 = vperm.xlu1 %668, %v283_v34   ;;  %308 = vperm.xlu0 %667, %v286_v35  }
  0x3c   :  { %603 = vmatmul.msk.bf16.gmra.mxu0 %vm177_vm0, %v643_v36 }
  0x3d   :  { %298 = vperm.xlu2 %669, %v284_v37  }
  0x42   :  { %421 = vperm.xlu1 %668, %v403_v38   ;;  %416 = vperm.xlu0 %667, %v402_v39  }
  0x45   :  { %406 = vperm.xlu2 %669, %v400_v40  }
  0x4a   :  { %472 = vperm.xlu1 %668, %v468_v41   ;;  %411 = vperm.xlu0 %667, %v401_v42  }
  0x4c   :  { %604 = vmatmul.msk.bf16.gmra.mxu0 %vm177_vm0, %v644_v43 }
  0x4d   :  { %477 = vperm.xlu2 %669, %v469_v44  }
  0x52   :  { %513 = vperm.xlu1 %668, %v505_v45   ;;  %508 = vperm.xlu0 %667, %v504_v46  }
  0x55   :  { %528 = vperm.xlu2 %669, %v525_v47  }
  0x5e   :  { %v110_v48 = vpop.permute.xlu2 %109 }
  0x67   :  { %v115_v50 = vpop.permute.xlu2 %114 }
  0x6f   :  { %v90_v52 = vpop.permute.xlu2 %89 }
  0x74   :  { %v130_v49 = vpop.permute.xlu0 %129  ;;  %v120_v9 = vpop.permute.xlu1 %119 }
  0x77   :  { %v85_v56 = vpop.permute.xlu2 %84 }
  0x7c   :  { %v135_v51 = vpop.permute.xlu0 %134  ;;  %v125_v13 = vpop.permute.xlu1 %124 }
  0x7f   :  { %v60_v61 = vpop.permute.xlu2 %59 }
  0x84   :  { %v100_v53 = vpop.permute.xlu0 %99  ;;  %v105_v31 = vpop.permute.xlu1 %104 }
  0x89   :  { %v211_v54 = vpop.f32.mrf.mxu0 }
  0x8a   :  { %v212_v63 = vadd.f32 %v211_v54, %v60_v61 }
  0x8c   :  { %v95_v55 = vpop.permute.xlu0 %94  ;;  %v251_v3 = vmax.f32 %v212_v63, 0.0  ;;  %v80_v33 = vpop.permute.xlu1 %79 }
  0x8f   :  { %v236_v57 = vpop.f32.mrf.mxu3 }
  0x90   :  { %v237_v21 = vadd.f32 %v236_v57, %v110_v48  ;;  %v651_v57 = vld [vmem:[%s904_s2 + $0x18] sm:$0xff] }
  0x91   :  { %v213_v58 = vpop.f32.mrf.mxu0 }
  0x92   :  { %v261_v26 = vmax.f32 %v237_v21, 0.0 }
  0x94   :  { %v870_v59 = vpop.permute.xlu0 %69  ;;  %v75_v46 = vpop.permute.xlu1 %74 }
  0x97   :  { %v238_v60 = vpop.f32.mrf.mxu3 }
  0x98   :  { %v239_v22 = vadd.f32 %v238_v60, %v115_v50 }
  0x99   :  { %v216_v62 = vpop.f32.mrf.mxu0 }
  0x9a   :  { %v262_v27 = vmax.f32 %v239_v22, 0.0  ;;  %v217_v50 = vadd.f32 %v216_v62, %v870_v59  ;;  %v650_v59 = vld [vmem:[%s904_s2 + $0x10] sm:$0xff] }
  0x9c   :  { %v65_v0 = vpop.permute.xlu0 %64  ;;  %v280_v30 = vpack.c.bf16 %v262_v27, %v261_v26  ;;  %v253_v54 = vmax.f32 %v217_v50, 0.0  ;;  %v324_v63 = vpop.permute.xlu1 %323 }
  0x9d   :  { %v214_v1 = vadd.f32 %v213_v58, %v65_v0  ;;  %v649_v58 = vld [vmem:[%s904_s2 + $0x8] sm:$0xff] }
  0x9f   :  { %v241_v2 = vpop.f32.mrf.mxu3  ;;  %v252_v4 = vmax.f32 %v214_v1, 0.0  ;;  %v329_v1 = vpop.permute.xlu2 %328 }
  0xa0   :  { %v242_v15 = vadd.f32 %v241_v2, %v120_v9 }
  0xa1   :  { %v218_v5 = vpop.f32.mrf.mxu0  ;;  %v872_v6 = vpack.c.bf16 %v252_v4, %v251_v3 }
  0xa2   :  { %v263_v23 = vmax.f32 %v242_v15, 0.0  ;;  %v219_v47 = vadd.f32 %v218_v5, %v75_v46 }
  0xa4   :  { %v314_v9 = vpop.permute.xlu0 %313 }
  0xa7   :  { %v243_v7 = vpop.f32.mrf.mxu3 }
  0xa8   :  { %v244_v16 = vadd.f32 %v243_v7, %v125_v13 }
  0xa9   :  { %v221_v8 = vpop.f32.mrf.mxu0 }
  0xaa   :  { %v264_v24 = vmax.f32 %v244_v16, 0.0  ;;  %v222_v44 = vadd.f32 %v221_v8, %v80_v33  ;;  %v653_v33 = vld [vmem:[%s904_s2 + $0x28] sm:$0xff] }
  0xac   :  { %v281_v28 = vpack.c.bf16 %v264_v24, %v263_v23 }
  0xaf   :  { %v246_v10 = vpop.f32.mrf.mxu3 }
  0xb0   :  { %v247_v12 = vadd.f32 %v246_v10, %v130_v49 }
  0xb1   :  { %v223_v11 = vpop.f32.mrf.mxu0 }
  0xb2   :  { %v265_v17 = vmax.f32 %v247_v12, 0.0  ;;  %v224_v41 = vadd.f32 %v223_v11, %v85_v56  ;;  %v648_v56 = vld [vmem:[%s904_s2] sm:$0xff]  ;;  %v304_v11 = vpop.permute.xlu2 %303  ;;  %v319_v12 = vpop.permute.xlu1 %318 }
  0xb4   :  { %v256_v48 = vmax.f32 %v224_v41, 0.0 }
  0xb7   :  { %v248_v14 = vpop.f32.mrf.mxu3 }
  0xb8   :  { %v249_v18 = vadd.f32 %v248_v14, %v135_v51  ;;  %v255_v51 = vmax.f32 %v222_v44, 0.0  ;;  %v309_v14 = vpop.permute.xlu0 %308 }
  0xb9   :  { %v226_v19 = vpop.f32.mrf.mxu0 }
  0xba   :  { %v266_v20 = vmax.f32 %v249_v18, 0.0  ;;  %v227_v38 = vadd.f32 %v226_v19, %v90_v52  ;;  %v277_v52 = vpack.c.bf16 %v256_v48, %v255_v51  ;;  %v299_v21 = vpop.permute.xlu2 %298 }
  0xbc   :  { %v282_v25 = vpack.c.bf16 %v266_v20, %v265_v17  ;;  %v257_v45 = vmax.f32 %v227_v38, 0.0 }
  0xbe   :  { %355 = vmatpush.bf16.msra.mxu1 %v282_v25  ;;  %657 = vmatpush.bf16.msra.mxu2 %v282_v25  ;;  %v294_v25 = vpop.permute.xlu1 %293 }
  0xc1   :  { %v228_v29 = vpop.f32.mrf.mxu0 }
  0xc2   :  { %356 = vmatpush.bf16.msra.mxu1 %v281_v28  ;;  %658 = vmatpush.bf16.msra.mxu2 %v281_v28  ;;  %v229_v36 = vadd.f32 %v228_v29, %v95_v55  ;;  %v407_v44 = vpop.permute.xlu2 %406 }
  0xc4   :  { %v258_v42 = vmax.f32 %v229_v36, 0.0  ;;  %v417_v36 = vpop.permute.xlu0 %416 }
  0xc6   :  { %357 = vmatpush.bf16.msra.mxu1 %v280_v30  ;;  %659 = vmatpush.bf16.msra.mxu2 %v280_v30  ;;  %v278_v49 = vpack.c.bf16 %v258_v42, %v257_v45  ;;  %v422_v38 = vpop.permute.xlu1 %421 }
  0xc9   :  { %v231_v32 = vpop.f32.mrf.mxu0 }
  0xca   :  { %v232_v34 = vadd.f32 %v231_v32, %v100_v53  ;;  %v254_v53 = vmax.f32 %v219_v47, 0.0  ;;  %v652_v32 = vld [vmem:[%s904_s2 + $0x20] sm:$0xff] }
  0xcc   :  { %v259_v39 = vmax.f32 %v232_v34, 0.0  ;;  %v276_v55 = vpack.c.bf16 %v254_v53, %v253_v54  ;;  %v654_v53 = vld [vmem:[%s904_s2 + $0x30] sm:$0xff]  ;;  %s701_s2 = smov [#allocation2]  }
  0xcd   :  { %s557_s9 = sshll.u32 %s701_s2, 4  ;;  %s558_s9 = int_to_ptr.vmem [resolvable:$true] %s557_s9 }
  0xce   :  { %v473_v54 = vpop.permute.xlu1 %472 }
  0xd1   :  { %v233_v35 = vpop.f32.mrf.mxu0 }
  0xd2   :  { %v234_v37 = vadd.f32 %v233_v35, %v105_v31 }
  0xd4   :  { %v260_v40 = vmax.f32 %v234_v37, 0.0 }
  0xd6   :  { %v279_v43 = vpack.c.bf16 %v260_v40, %v259_v39  ;;  %v412_v40 = vpop.permute.xlu0 %411 }
  0xd8   :  { %358 = vmatpush.bf16.msra.mxu1 %v279_v43  ;;  %660 = vmatpush.bf16.msra.mxu2 %v279_v43 }
  0xdc   :  { %359 = vmatpush.bf16.msra.mxu1 %v278_v49  ;;  %661 = vmatpush.bf16.msra.mxu2 %v278_v49 }
  0xe0   :  { %360 = vmatpush.bf16.msra.mxu1 %v277_v52  ;;  %662 = vmatpush.bf16.msra.mxu2 %v277_v52 }
  0xe4   :  { %361 = vmatpush.bf16.msra.mxu1 %v276_v55  ;;  %663 = vmatpush.bf16.msra.mxu2 %v276_v55 }
  0xe8   :  { %362 = vmatpush.bf16.msra.mxu1 %v872_v6  ;;  %664 = vmatpush.bf16.msra.mxu2 %v872_v6 }
  0xeb   :  { %363 = vmatmul.bf16.vlgmr.msra.gmra.mxu1 %v648_v56  ;;  %378 = vmatmul.bf16.vlgmr.msra.gmra.mxu2 %v651_v57  ;;  %v478_v56 = vpop.permute.xlu2 %477 }
  0xfb   :  { %368 = vmatmul.bf16.gmra.mxu1 %v649_v58 }
 0x10b   :  { %373 = vmatmul.bf16.gmra.mxu1 %v650_v59 }
 0x168   :  { %v364_v60 = vpop.f32.mrf.mxu1 }
 0x169   :  { %v365_v26 = vadd.f32 %v364_v60, %v294_v25 }
 0x16b   :  { %v384_v30 = vmax.f32 %v365_v26, 0.0 }
 0x16e   :  { %v379_v61 = vpop.f32.mrf.mxu2 }
 0x16f   :  { %v380_v0 = vadd.f32 %v379_v61, %v324_v63  ;;  %v514_v61 = vpop.permute.xlu1 %513 }
 0x170   :  { %v366_v62 = vpop.f32.mrf.mxu1 }
 0x171   :  { %v390_v5 = vmax.f32 %v380_v0, 0.0  ;;  %v367_v22 = vadd.f32 %v366_v62, %v299_v21  ;;  %v509_v62 = vpop.permute.xlu0 %508 }
 0x173   :  { %v385_v28 = vmax.f32 %v367_v22, 0.0 }
 0x175   :  { %v396_v31 = vpack.c.bf16 %v385_v28, %v384_v30 }
 0x176   :  { %v381_v2 = vpop.f32.mrf.mxu2 }
 0x177   :  { %v382_v3 = vadd.f32 %v381_v2, %v329_v1 }
 0x178   :  { %v369_v4 = vpop.f32.mrf.mxu1 }
 0x179   :  { %v391_v6 = vmax.f32 %v382_v3, 0.0  ;;  %v370_v18 = vadd.f32 %v369_v4, %v304_v11 }
 0x17b   :  { %v399_v7 = vpack.c.bf16 %v391_v6, %v390_v5  ;;  %v386_v27 = vmax.f32 %v370_v18, 0.0 }
 0x17d   :  { %445 = vmatpush.bf16.msrb.mxu2 %v399_v7 }
 0x180   :  { %v371_v8 = vpop.f32.mrf.mxu1 }
 0x181   :  { %v372_v16 = vadd.f32 %v371_v8, %v309_v14  ;;  %v529_v8 = vpop.permute.xlu2 %528 }
 0x183   :  { %v387_v23 = vmax.f32 %v372_v16, 0.0 }
 0x185   :  { %v397_v29 = vpack.c.bf16 %v387_v23, %v386_v27 }
 0x188   :  { %v374_v10 = vpop.f32.mrf.mxu1 }
 0x189   :  { %v375_v13 = vadd.f32 %v374_v10, %v314_v9 }
 0x18b   :  { %v388_v19 = vmax.f32 %v375_v13, 0.0 }
 0x190   :  { %v376_v15 = vpop.f32.mrf.mxu1 }
 0x191   :  { %v377_v17 = vadd.f32 %v376_v15, %v319_v12 }
 0x193   :  { %v389_v20 = vmax.f32 %v377_v17, 0.0 }
 0x195   :  { %v398_v24 = vpack.c.bf16 %v389_v20, %v388_v19 }
 0x197   :  { %446 = vmatpush.bf16.msrb.mxu2 %v398_v24 }
 0x19b   :  { %447 = vmatpush.bf16.msrb.mxu2 %v397_v29 }
 0x19f   :  { %448 = vmatpush.bf16.msrb.mxu2 %v396_v31 }
 0x1a2   :  { %632 = vmatmul.msk.bf16.vlgmr.msrb.gmra.mxu2 %vm434_vm1, %v652_v32 }
 0x1b2   :  { %633 = vmatmul.msk.bf16.gmra.mxu2 %vm434_vm1, %v653_v33 }
 0x225   :  { %v450_v34 = vpop.f32.mrf.mxu2 }
 0x226   :  { %v451_v45 = vadd.f32 %v450_v34, %v407_v44 }
 0x228   :  { %v460_v50 = vmax.f32 %v451_v45, 0.0 }
 0x22d   :  { %v452_v35 = vpop.f32.mrf.mxu2 }
 0x22e   :  { %v453_v42 = vadd.f32 %v452_v35, %v412_v40 }
 0x230   :  { %v461_v48 = vmax.f32 %v453_v42, 0.0 }
 0x232   :  { %v466_v51 = vpack.c.bf16 %v461_v48, %v460_v50 }
 0x235   :  { %v455_v37 = vpop.f32.mrf.mxu2 }
 0x236   :  { %v456_v39 = vadd.f32 %v455_v37, %v417_v36 }
 0x238   :  { %v462_v46 = vmax.f32 %v456_v39, 0.0 }
 0x23d   :  { %v457_v41 = vpop.f32.mrf.mxu2 }
 0x23e   :  { %v458_v43 = vadd.f32 %v457_v41, %v422_v38 }
 0x240   :  { %v463_v47 = vmax.f32 %v458_v43, 0.0 }
 0x242   :  { %v467_v49 = vpack.c.bf16 %v463_v47, %v462_v46 }
 0x244   :  { %494 = vmatpush.bf16.msrb.mxu3 %v467_v49 }
 0x248   :  { %495 = vmatpush.bf16.msrb.mxu3 %v466_v51 }
 0x24b   :  { %638 = vmatmul.msk.bf16.vlgmr.msrb.gmra.mxu3 %vm177_vm0, %v654_v53 }
 0x2ce   :  { %v497_v52 = vpop.f32.mrf.mxu3 }
 0x2cf   :  { %v498_v55 = vadd.f32 %v497_v52, %v473_v54 }
 0x2d1   :  { %v502_v58 = vmax.f32 %v498_v55, 0.0 }
 0x2d3   :  { %v516_v63 = vmul.f32 %v509_v62, %v502_v58 }
 0x2d6   :  { %v499_v57 = vpop.f32.mrf.mxu3 }
 0x2d7   :  { %v500_v59 = vadd.f32 %v499_v57, %v478_v56 }
 0x2d9   :  { %v503_v60 = vmax.f32 %v500_v59, 0.0 }
 0x2db   :  { %v517_v0 = vmul.f32 %v514_v61, %v503_v60 }
 0x2dd   :  { %v518_v1 = vadd.f32 %v517_v0, %v516_v63 }
 0x2df   :  { %v519_v2 = vrot.slane %v518_v1, 4 }
 0x2e1   :  { %v520_v3 = vadd.f32 %v519_v2, %v518_v1 }
 0x2e3   :  { %v521_v4 = vrot.slane %v520_v3, 2 }
 0x2e5   :  { %v522_v5 = vadd.f32 %v521_v4, %v520_v3 }
 0x2e7   :  { %v523_v6 = vrot.slane %v522_v5, 1 }
 0x2e9   :  { %v524_v7 = vadd.f32 %v523_v6, %v522_v5 }
 0x2eb   :  { %v531_v9 = vadd.f32 %v529_v8, %v524_v7 }
 0x2ed   :  { %v639_v10 = vmul.f32 -1.442695, %v531_v9 }
 0x2ef   :  { %670 = vpow2.f32 %v639_v10 }
 0x2f5   :  { %v671_v11 = vpop.eup %670 }
 0x2f6   :  { %v535_v12 = vadd.f32 1.0, %v671_v11 }
 0x2f8   :  { %672 = vrcp.f32 %v535_v12  ;;  %v547_v16 = vand.u32 2147483648, %v535_v12  ;;  %v545_v18 = vand.u32 2147483647, %v535_v12  ;;  %vm541_vm3 = vweird.f32 %v535_v12 }
 0x2fa   :  { %v548_v20 = vor.u32 1.1754944e-38, %v547_v16  ;;  %vm546_vm5 = vcmp.eq.f32.partialorder %v545_v18, 8.507059e+37 }
 0x2fe   :  { %v673_v13 = vpop.eup %672 }
 0x2ff   :  { %v537_v14 = vmul.f32 %v673_v13, %v535_v12  ;;  %vm542_vm2 = vweird.f32 %v673_v13 }
 0x300   :  { %vm543_vm4 = vmor %vm541_vm3, %vm542_vm2 }
 0x301   :  { %v538_v15 = vsub.f32 1.0, %v537_v14 }
 0x303   :  { %v539_v17 = vmul.f32 %v673_v13, %v538_v15 }
 0x305   :  { %v540_v19 = vadd.f32 %v673_v13, %v539_v17 }
 0x307   :  { %v544_v21 = vsel %vm543_vm4, %v673_v13, %v540_v19 }
 0x308   :  { %v549_v22 = vsel %vm546_vm5, %v548_v20, %v544_v21 }
 0x309   :  { %551 = vst [vmem:[#allocation2] sm:$0x1] %v549_v22 }
 0x30a   :  { %562 = dma.vmem_to_hbm [thread:$0]  %s558_s9, 16, %s560_s12, [#allocation3]  }
 0x30b   :  { %698 = dma.done.wait [#allocation3], 16  }
 0x30c   :  { %699 = vsyncadd [#allocation3], 4294967280 }
 0x30d   :  { %567 = vsyncpa [#allocation3], 1 }

</bundles_post_ra>
